<compile_context>
chip_gen: v7x
topology: tpu7x:2x2x1
jax: 0.10.0
libtpu: 0.0.40
codegen_flags: <defaults>
</compile_context>

<pallas_src>
import functools

import jax
import jax.numpy as jnp
from jax.experimental import pallas as pl
from jax.experimental.pallas import tpu as pltpu


def _round_up(n, m):
    return ((n + m - 1) // m) * m


def _mlp_kernel(x_ref, w1t_ref, b1_ref, w2t_ref, b2_ref, o_ref):
    # (TILE_B, I_p) @ (I_p, H_p) -> (TILE_B, H_p), MXU with f32 accumulation.
    h = jnp.dot(x_ref[...], w1t_ref[...], preferred_element_type=jnp.float32)
    h = jnp.maximum(h + b1_ref[...], 0.0)  # bias + ReLU in f32 on the VPU
    # (TILE_B, H_p) @ (H_p, C_p) -> (TILE_B, C_p)
    out = jnp.dot(h, w2t_ref[...], preferred_element_type=jnp.float32)
    o_ref[...] = (out + b2_ref[...]).astype(o_ref.dtype)


@functools.partial(jax.jit, static_argnames=("tile_b",))
def simple_neural_net(x, w1, b1, w2, b2, *, tile_b=None):
    """Fused MLP forward pass: y = ReLU(x @ w1.T + b1) @ w2.T + b2.

    x : (B, I) float32
    w1: (H, I) float32   b1: (H,) float32   (PyTorch nn.Linear convention)
    w2: (C, H) float32   b2: (C,) float32
    returns (B, C) float32
    """
    B, I = x.shape
    H = w1.shape[0]
    C = w2.shape[0]

    # Lane-dense padding: last dims up to multiples of 128.
    I_p = _round_up(I, 128)
    H_p = _round_up(H, 128)
    C_p = _round_up(C, 128)

    # Batch tile: multiple of 8 (sublane), capped so double-buffered (TILE_B, I_p) /
    # (TILE_B, C_p) tiles plus resident weights stay far under VMEM on every
    # generation (including v7x's 64 MiB).
    if tile_b is None:
        tile_b = min(256, _round_up(B, 8))
    tile_b = _round_up(tile_b, 8)
    B_p = _round_up(B, tile_b)

    # Pre-transpose weights in the wrapper (done once by XLA, no in-kernel .T) and
    # zero-pad so the padded regions contribute exactly zero to the result.
    x_p = jnp.zeros((B_p, I_p), x.dtype).at[:B, :I].set(x)
    w1t = jnp.zeros((I_p, H_p), w1.dtype).at[:I, :H].set(w1.T)
    b1_p = jnp.zeros((1, H_p), b1.dtype).at[0, :H].set(b1)
    w2t = jnp.zeros((H_p, C_p), w2.dtype).at[:H, :C].set(w2.T)
    b2_p = jnp.zeros((1, C_p), b2.dtype).at[0, :C].set(b2)

    grid = (B_p // tile_b,)

    out_p = pl.pallas_call(
        _mlp_kernel,
        out_shape=jax.ShapeDtypeStruct((B_p, C_p), jnp.float32),
        grid_spec=pltpu.PrefetchScalarGridSpec(
            num_scalar_prefetch=0,
            grid=grid,
            in_specs=[
                pl.BlockSpec((tile_b, I_p), lambda i: (i, 0)),  # x: tiled over batch
                pl.BlockSpec((I_p, H_p), lambda i: (0, 0)),     # w1.T: resident
                pl.BlockSpec((1, H_p), lambda i: (0, 0)),       # b1:   resident
                pl.BlockSpec((H_p, C_p), lambda i: (0, 0)),     # w2.T: resident
                pl.BlockSpec((1, C_p), lambda i: (0, 0)),       # b2:   resident
            ],
            out_specs=pl.BlockSpec((tile_b, C_p), lambda i: (i, 0)),
        ),
        compiler_params=pltpu.CompilerParams(
            # Batch axis is independent -> megacore split on v7x, pipelined everywhere.
            dimension_semantics=("parallel",),
        ),
    )(x_p, w1t, b1_p, w2t, b2_p)

    # Slice the lane/batch padding back off.
    return out_p[:B, :C]


def _reference(x, w1, b1, w2, b2):
    h = jnp.maximum(x @ w1.T + b1, 0.0)
    return h @ w2.T + b2


if __name__ == "__main__":
    # Small shapes consistent with the module: input_size=64, hidden_size=32, num_classes=10.
    batch, input_size, hidden_size, num_classes = 8, 64, 32, 10

    key = jax.random.PRNGKey(0)
    kx, kw1, kb1, kw2, kb2 = jax.random.split(key, 5)

    x = jax.random.normal(kx, (batch, input_size), dtype=jnp.float32)
    # Deterministic PyTorch-style uniform init bounds.
    bound1 = 1.0 / (input_size ** 0.5)
    bound2 = 1.0 / (hidden_size ** 0.5)
    w1 = jax.random.uniform(kw1, (hidden_size, input_size), jnp.float32, -bound1, bound1)
    b1 = jax.random.uniform(kb1, (hidden_size,), jnp.float32, -bound1, bound1)
    w2 = jax.random.uniform(kw2, (num_classes, hidden_size), jnp.float32, -bound2, bound2)
    b2 = jax.random.uniform(kb2, (num_classes,), jnp.float32, -bound2, bound2)

    out = simple_neural_net(x, w1, b1, w2, b2)
    out = jax.block_until_ready(out)

    ref = _reference(x, w1, b1, w2, b2)
    assert out.shape == (batch, num_classes)
    assert jnp.allclose(out, ref, atol=1e-5, rtol=1e-5), "mismatch vs reference"

    print("KERNEL_OK")
</pallas_src>

<mosaic_0001>
module attributes {stable_mosaic.version = 11 : i64} {
  func.func @_mlp_kernel(%arg0: i32, %arg1: memref<8x128xf32, #tpu.memory_space<vmem>>, %arg2: memref<128x128xf32, #tpu.memory_space<vmem>>, %arg3: memref<1x128xf32, #tpu.memory_space<vmem>>, %arg4: memref<128x128xf32, #tpu.memory_space<vmem>>, %arg5: memref<1x128xf32, #tpu.memory_space<vmem>>, %arg6: memref<8x128xf32, #tpu.memory_space<vmem>>) attributes {dimension_semantics = [#tpu.dimension_semantics<parallel>], iteration_bounds = array<i64: 1>, scalar_prefetch = 0 : i64, scratch_operands = 0 : i64, tpu.core_type = #tpu.core_type<tc>, window_params = [{transform_indices = @transform_0, window_bounds = array<i64: 8, 128>}, {pipeline_mode = #tpu.pipeline_mode<synchronous>, transform_indices = @transform_1, window_bounds = array<i64: 128, 128>}, {pipeline_mode = #tpu.pipeline_mode<synchronous>, transform_indices = @transform_2, window_bounds = array<i64: 1, 128>}, {pipeline_mode = #tpu.pipeline_mode<synchronous>, transform_indices = @transform_3, window_bounds = array<i64: 128, 128>}, {pipeline_mode = #tpu.pipeline_mode<synchronous>, transform_indices = @transform_4, window_bounds = array<i64: 1, 128>}, {transform_indices = @transform_5, window_bounds = array<i64: 8, 128>}]} {
    %c0 = arith.constant 0 : index
    %c0_0 = arith.constant 0 : index
    %0 = vector.load %arg1[%c0, %c0_0] : memref<8x128xf32, #tpu.memory_space<vmem>>, vector<8x128xf32>
    %c0_1 = arith.constant 0 : index
    %c0_2 = arith.constant 0 : index
    %1 = vector.load %arg2[%c0_1, %c0_2] : memref<128x128xf32, #tpu.memory_space<vmem>>, vector<128x128xf32>
    %cst = arith.constant dense<0.000000e+00> : vector<8x128xf32>
    %2 = tpu.matmul %0, %1, %cst {dimension_numbers = #tpu.dot_dimension_numbers<[1], [0], [0], [1], [0, 0, 1, 1], [], []>} : vector<8x128xf32>, vector<128x128xf32>, vector<8x128xf32> -> vector<8x128xf32>
    %c0_3 = arith.constant 0 : index
    %c0_4 = arith.constant 0 : index
    %3 = vector.load %arg3[%c0_3, %c0_4] : memref<1x128xf32, #tpu.memory_space<vmem>>, vector<1x128xf32>
    %4 = vector.broadcast %3 : vector<1x128xf32> to vector<8x128xf32>
    %5 = arith.addf %2, %4 : vector<8x128xf32>
    %cst_5 = arith.constant 0.000000e+00 : f32
    %6 = vector.broadcast %cst_5 : f32 to vector<8x128xf32>
    %7 = arith.maximumf %5, %6 : vector<8x128xf32>
    %c0_6 = arith.constant 0 : index
    %c0_7 = arith.constant 0 : index
    %8 = vector.load %arg4[%c0_6, %c0_7] : memref<128x128xf32, #tpu.memory_space<vmem>>, vector<128x128xf32>
    %cst_8 = arith.constant dense<0.000000e+00> : vector<8x128xf32>
    %9 = tpu.matmul %7, %8, %cst_8 {dimension_numbers = #tpu.dot_dimension_numbers<[1], [0], [0], [1], [0, 0, 1, 1], [], []>} : vector<8x128xf32>, vector<128x128xf32>, vector<8x128xf32> -> vector<8x128xf32>
    %c0_9 = arith.constant 0 : index
    %c0_10 = arith.constant 0 : index
    %10 = vector.load %arg5[%c0_9, %c0_10] : memref<1x128xf32, #tpu.memory_space<vmem>>, vector<1x128xf32>
    %11 = vector.broadcast %10 : vector<1x128xf32> to vector<8x128xf32>
    %12 = arith.addf %9, %11 : vector<8x128xf32>
    %c0_11 = arith.constant 0 : index
    %c0_12 = arith.constant 0 : index
    %13 = vector.load %arg6[%c0_11, %c0_12] : memref<8x128xf32, #tpu.memory_space<vmem>>, vector<8x128xf32>
    tpu.vector_store %arg6[%c0_11, %c0_12], %12 {strides = array<i32>} : memref<8x128xf32, #tpu.memory_space<vmem>>, vector<8x128xf32>,
    return
  }
  func.func @transform_0(%arg0: i32) -> (i32, i32) {
    %c0_i32 = arith.constant 0 : i32
    %c0_i32_0 = arith.constant 0 : i32
    return %arg0, %c0_i32 : i32, i32
  }
  func.func @transform_1(%arg0: i32) -> (i32, i32) {
    %c0_i32 = arith.constant 0 : i32
    %c0_i32_0 = arith.constant 0 : i32
    %c0_i32_1 = arith.constant 0 : i32
    return %c0_i32, %c0_i32_0 : i32, i32
  }
  func.func @transform_2(%arg0: i32) -> (i32, i32) {
    %c0_i32 = arith.constant 0 : i32
    %c0_i32_0 = arith.constant 0 : i32
    %c0_i32_1 = arith.constant 0 : i32
    return %c0_i32, %c0_i32_0 : i32, i32
  }
  func.func @transform_3(%arg0: i32) -> (i32, i32) {
    %c0_i32 = arith.constant 0 : i32
    %c0_i32_0 = arith.constant 0 : i32
    %c0_i32_1 = arith.constant 0 : i32
    return %c0_i32, %c0_i32_0 : i32, i32
  }
  func.func @transform_4(%arg0: i32) -> (i32, i32) {
    %c0_i32 = arith.constant 0 : i32
    %c0_i32_0 = arith.constant 0 : i32
    %c0_i32_1 = arith.constant 0 : i32
    return %c0_i32, %c0_i32_0 : i32, i32
  }
  func.func @transform_5(%arg0: i32) -> (i32, i32) {
    %c0_i32 = arith.constant 0 : i32
    %c0_i32_0 = arith.constant 0 : i32
    return %arg0, %c0_i32 : i32, i32
  }
}

</mosaic_0001>

<bundles_post_ra>
// kernel: simple_neural_net.1
= control target key start
LH: loop header
LB: loop body
LE: loop exit
PB: predicated region body
PF: predicated region fallthrough
CT: control target
= control target key end

     0   :  { %v406_v3 = vmov 0.0|0.0   ;;  %vm407_vm0 = vmmov 0   ;;  %v408_v6 = vmov 0.0   ;;  %s573_s0 = inlined_call_operand.vmem [shape: f32[8,128], index: 0, kind: input, shape index: {}]   ;;  %s574_s1 = inlined_call_operand.vmem [shape: f32[128,128], index: 1, kind: input, shape index: {}]   ;;  %s575_s2 = inlined_call_operand.vmem [shape: f32[1,128], index: 2, kind: input, shape index: {}]   ;;  %s576_s3 = inlined_call_operand.vmem [shape: f32[128,128], index: 3, kind: input, shape index: {}]   ;;  %s577_s4 = inlined_call_operand.vmem [shape: f32[1,128], index: 4, kind: input, shape index: {}]   ;;  %s578_s5 = inlined_call_operand.hbm [shape: f32[8,128], index: 5, kind: output, shape index: {}]  }
   0x1   :  { %v22_v0 = vld [vmem:[%s574_s1] sm:$0xff]  ;;  %v23_v1 = vld [vmem:[%s574_s1 + $0x8] sm:$0xff]  ;;  %v24_v2 = vld [vmem:[%s574_s1 + $0x10] sm:$0xff]  ;;  %330 = vmatprep.subr.bf16.mxu0 %v406_v3  ;;  %292 = vmatprep.mubr.msk.f32.mxu0 %vm407_vm0, %v408_v6 }
   0x2   :  { %v331_v4 = vpack.c.bf16 %v23_v1, %v22_v0  ;;  %v25_v5 = vld [vmem:[%s574_s1 + $0x18] sm:$0xff]  ;;  %354 = vmatprep.subr.bf16.mxu1 %v406_v3  ;;  %327 = vmatprep.mubr.msk.f32.mxu1 %vm407_vm0, %v408_v6  ;;  %v26_v8 = vld [vmem:[%s574_s1 + $0x20] sm:$0xff]  ;;  %v27_v9 = vld [vmem:[%s574_s1 + $0x28] sm:$0xff] }
   0x3   :  { %v334_v7 = vpack.c.bf16 %v25_v5, %v24_v2  ;;  %v116_v10 = vld [vmem:[%s576_s3] sm:$0xff]  ;;  %v117_v11 = vld [vmem:[%s576_s3 + $0x8] sm:$0xff]  ;;  %v118_v12 = vld [vmem:[%s576_s3 + $0x10] sm:$0xff]  ;;  %v337_v14 = vpack.c.bf16 %v27_v9, %v26_v8 }
   0x4   :  { %332 = vmatpush3.bf16.msra.mxu0 %v331_v4  ;;  %v119_v13 = vld [vmem:[%s576_s3 + $0x18] sm:$0xff]  ;;  %v355_v15 = vpack.c.bf16 %v117_v11, %v116_v10  ;;  %v28_v16 = vld [vmem:[%s574_s1 + $0x30] sm:$0xff]  ;;  %v120_v19 = vld [vmem:[%s576_s3 + $0x20] sm:$0xff] }
   0x5   :  { %333 = vmatprep.subr.bf16.mxu0 %v406_v3  ;;  %v29_v17 = vld [vmem:[%s574_s1 + $0x38] sm:$0xff]  ;;  %v358_v18 = vpack.c.bf16 %v119_v13, %v118_v12  ;;  %v121_v20 = vld [vmem:[%s576_s3 + $0x28] sm:$0xff] }
   0x6   :  { %356 = vmatpush3.bf16.msra.mxu1 %v355_v15 }
   0x7   :  { %357 = vmatprep.subr.bf16.mxu1 %v406_v3 }
   0x8   :  { %335 = vmatpush3.bf16.msra.mxu0 %v334_v7 }
   0x9   :  { %336 = vmatprep.subr.bf16.mxu0 %v406_v3 }
   0xa   :  { %10 = vsyncpa [#allocation3], 0  ;;  %v340_v21 = vpack.c.bf16 %v29_v17, %v28_v16  ;;  %v30_v22 = vld [vmem:[%s574_s1 + $0x40] sm:$0xff]  ;;  %v31_v23 = vld [vmem:[%s574_s1 + $0x48] sm:$0xff]  ;;  %359 = vmatpush3.bf16.msra.mxu1 %v358_v18  ;;  %v361_v24 = vpack.c.bf16 %v121_v20, %v120_v19  ;;  %s409_s11 = smov [#allocation2]  }
   0xb   :  { %360 = vmatprep.subr.bf16.mxu1 %v406_v3  ;;  %v122_v25 = vld [vmem:[%s576_s3 + $0x30] sm:$0xff]  ;;  %v123_v26 = vld [vmem:[%s576_s3 + $0x38] sm:$0xff]  ;;  %v343_v27 = vpack.c.bf16 %v31_v23, %v30_v22  ;;  %v124_v31 = vld [vmem:[%s576_s3 + $0x40] sm:$0xff]  ;;  %s216_s12 = sshll.u32 %s409_s11, 4  ;;  %s217_s12 = int_to_ptr.vmem [resolvable:$true] %s216_s12 }
   0xc   :  { %338 = vmatpush3.bf16.msra.mxu0 %v337_v14  ;;  %v32_v28 = vld [vmem:[%s574_s1 + $0x50] sm:$0xff]  ;;  %v33_v29 = vld [vmem:[%s574_s1 + $0x58] sm:$0xff]  ;;  %v364_v30 = vpack.c.bf16 %v123_v26, %v122_v25  ;;  %v125_v32 = vld [vmem:[%s576_s3 + $0x48] sm:$0xff]  ;;  %p387_p1 = scmp.lt.s32.totalorder %s217_s12, %s217_s12 }
   0xd   :  { %339 = vmatprep.subr.bf16.mxu0 %v406_v3  ;;  %v346_v33 = vpack.c.bf16 %v33_v29, %v32_v28  ;;  %v34_v34 = vld [vmem:[%s574_s1 + $0x60] sm:$0xff]  ;;  %v35_v35 = vld [vmem:[%s574_s1 + $0x68] sm:$0xff]  ;;  %v367_v36 = vpack.c.bf16 %v125_v32, %v124_v31  ;;  %v126_v37 = vld [vmem:[%s576_s3 + $0x50] sm:$0xff] }
   0xe   :  { %362 = vmatpush3.bf16.msra.mxu1 %v361_v24  ;;  %v127_v38 = vld [vmem:[%s576_s3 + $0x58] sm:$0xff]  ;;  %v349_v39 = vpack.c.bf16 %v35_v35, %v34_v34  ;;  %v36_v40 = vld [vmem:[%s574_s1 + $0x70] sm:$0xff]  ;;  %v128_v43 = vld [vmem:[%s576_s3 + $0x60] sm:$0xff] }
   0xf   :  { %363 = vmatprep.subr.bf16.mxu1 %v406_v3  ;;  %v37_v41 = vld [vmem:[%s574_s1 + $0x78] sm:$0xff]  ;;  %v370_v42 = vpack.c.bf16 %v127_v38, %v126_v37  ;;  %v129_v44 = vld [vmem:[%s576_s3 + $0x68] sm:$0xff]  ;;  %v21_v47 = vld [vmem:[%s573_s0] sm:$0xff] }
  0x10   :  { %341 = vmatpush3.bf16.msra.mxu0 %v340_v21  ;;  %v352_v45 = vpack.c.bf16 %v37_v41, %v36_v40  ;;  %v373_v46 = vpack.c.bf16 %v129_v44, %v128_v43  ;;  %v130_v48 = vld [vmem:[%s576_s3 + $0x70] sm:$0xff]  ;;  %v131_v49 = vld [vmem:[%s576_s3 + $0x78] sm:$0xff]  ;;  %v224_v51 = vld [vmem:[%s575_s2] ss:$0 sm:$0xff]  ;;  %s382_s3 = scalar_lea.vmem %s217_s12, 128 }
  0x11   :  { %342 = vmatprep.subr.bf16.mxu0 %v406_v3  ;;  %v376_v50 = vpack.c.bf16 %v131_v49, %v130_v48  ;;  %v225_v56 = vld [vmem:[%s577_s4] ss:$0 sm:$0xff]  ;;  %p383_p0 = scmp.ne.s32.totalorder %s217_s12, %s382_s3  ;;  %p388_p2 = scmp.lt.s32.totalorder %s382_s3, %s382_s3 }
  0x12   :  { %365 = vmatpush3.bf16.msra.mxu1 %v364_v30 }
  0x13   :  { %366 = vmatprep.subr.bf16.mxu1 %v406_v3  ;;  %p389_p3 = por %p388_p2, %p387_p1 }
  0x14   :  { %344 = vmatpush3.bf16.msra.mxu0 %v343_v27 }
  0x15   :  { %345 = vmatprep.subr.bf16.mxu0 %v406_v3  ;;  %p390_p4 = pnand %p389_p3, %p383_p0 }
  0x16   :  { %368 = vmatpush3.bf16.msra.mxu1 %v367_v36 }
  0x17   :  { %369 = vmatprep.subr.bf16.mxu1 %v406_v3 }
  0x18   :  { %347 = vmatpush3.bf16.msra.mxu0 %v346_v33 }
  0x19   :  { %348 = vmatprep.subr.bf16.mxu0 %v406_v3 }
  0x1a   :  { %371 = vmatpush3.bf16.msra.mxu1 %v370_v42 }
  0x1b   :  { %372 = vmatprep.subr.bf16.mxu1 %v406_v3 }
  0x1c   :  { %350 = vmatpush3.bf16.msra.mxu0 %v349_v39 }
  0x1d   :  { %351 = vmatprep.subr.bf16.mxu0 %v406_v3 }
  0x1e   :  { %374 = vmatpush3.bf16.msra.mxu1 %v373_v46 }
  0x1f   :  { %375 = vmatprep.subr.bf16.mxu1 %v406_v3 }
  0x20   :  { %353 = vmatpush3.bf16.msra.mxu0 %v352_v45 }
  0x22   :  { %377 = vmatpush3.bf16.msra.mxu1 %v376_v50 }
  0x23   :  { %293 = vmatmul.mubr.f32.vlgmr.msra.gmra.mrb[0].mxu0 %v21_v47 }
  0xf6   :  { %v111_v52 = vpop.f32.mrb[0].mxu0 }
  0xf7   :  { %v112_v53 = vadd.f32 %v224_v51, %v111_v52  ;;  %v294_v54 = vpop.f32.mrb[1].mxu0 }
  0xf9   :  { %v115_v55 = vmax.f32 %v112_v53, 0.0 }
  0xfb   :  { %328 = vmatmul.mubr.f32.vlgmr.msra.gmra.mrb[0].mxu1 %v115_v55 }
 0x1ce   :  { %v205_v57 = vpop.f32.mrb[0].mxu1 }
 0x1cf   :  { %v206_v58 = vadd.f32 %v225_v56, %v205_v57  ;;  %v329_v59 = vpop.f32.mrb[1].mxu1 }
 0x1d1   :  { %209 = vst [vmem:[#allocation2] sm:$0xff] %v206_v58 }
 0x1d2   :  { %393 = shalt.err (!%p390_p4)
}
 0x1d3   :  { %s394_s14 = scalar_lea.hbm %s578_s5, 128 }
 0x1d4   :  { %p395_p5 = scmp.ne.s32.totalorder %s578_s5, %s394_s14  ;;  %p398_p6 = scmp.lt.u32.totalorder %s394_s14, %s578_s5 }
 0x1d6   :  { %p400_p7 = pnand %p398_p6, %p395_p5 }
 0x1d8   :  { %403 = shalt.err (!%p400_p7)
}
 0x1d9   :  { %219 = dma.vmem_to_hbm [thread:$0]  %s217_s12, 128, %s578_s5, [#allocation3]  }
 0x1da   :  { %404 = dma.done.wait [#allocation3], 128  }
 0x1db   :  { %405 = vsyncadd [#allocation3], 4294967168 }
 0x1dc   :  { %223 = vsyncpa [#allocation3], 1 }

</bundles_post_ra>
